<compile_context>
chip_gen: v6e
topology: v6e:2x2x1
jax: 0.10.0
libtpu: 0.0.40
codegen_flags: <defaults>
</compile_context>

<pallas_src>
import math
import numpy as np

import jax
import jax.numpy as jnp
from jax.experimental import pallas as pl
from jax.experimental.pallas import tpu as pltpu

LEAKY_SLOPE = 0.01  # PyTorch nn.LeakyReLU default


# ----------------------------------------------------------------------------
# Hot-path kernel: one N-tile  ->  transposed output tile (M, TN)
# ----------------------------------------------------------------------------
def _prf_kernel(omg_ref, x_ref, o_ref, *, softmax_temp, log_offset):
    """omg_ref: (M, D)  omega_gen pre-scaled by sqrt(softmax_temp)
       x_ref  : (TN, D) raw input rows
       o_ref  : (M, TN) transposed output tile (lane dim = TN, lane-dense)
    """
    x = x_ref[...]                                            # (TN, D) f32

    # u^T = (sqrt(t) * omega_gen) @ x^T  -> (M, TN)
    u_t = jax.lax.dot_general(
        omg_ref[...], x,
        (((1,), (1,)), ((), ())),
        preferred_element_type=jnp.float32)                   # (M, TN)

    # softmax_temp * ||x||^2 per row, produced directly as (1, TN) via an MXU
    # reduction so it broadcasts against u_t with no cross-lane transpose.
    t_row = jnp.full((1, x.shape[-1]), softmax_temp, dtype=jnp.float32)
    norm_t = jax.lax.dot_general(
        t_row, x * x,
        (((1,), (1,)), ((), ())),
        preferred_element_type=jnp.float32)                   # (1, TN)

    o_ref[...] = jnp.exp(u_t - (norm_t + log_offset))         # (M, TN)


# ----------------------------------------------------------------------------
# Wrapper
# ----------------------------------------------------------------------------
def _round_up(n, m):
    return ((n + m - 1) // m) * m


def generative_positive_random_features(x, omega, w1, b1, w2, b2,
                                         *, n_dims, softmax_temp):
    """x: (..., D). Returns (..., n_dims // 2) float32."""
    lead = x.shape[:-1]
    D = x.shape[-1]
    N = int(np.prod(lead)) if lead else 1
    M = omega.shape[0]

    # --- generator MLP (tiny: M x noise -> M x D), plain JAX, scale folded ---
    h = jnp.dot(omega.astype(jnp.float32), w1.astype(jnp.float32),
                preferred_element_type=jnp.float32) + b1.astype(jnp.float32)[None, :]
    h = jnp.where(h > 0, h, LEAKY_SLOPE * h)                  # leaky relu
    omega_gen = jnp.tanh(
        jnp.dot(h, w2.astype(jnp.float32), preferred_element_type=jnp.float32)
        + b2.astype(jnp.float32)[None, :])                    # (M, D)
    omg_scaled = omega_gen * jnp.float32(math.sqrt(softmax_temp))

    # --- N tiling: big tiles, cdiv + zero padding (never one giant block) ---
    TN_MAX = 8192   # x tile = 1 MiB f32, out tile = M*TN*4 — a few MiB w/ buffers
    TN_MIN = 256    # keeps the lane dim of the output a multiple of 128
    g = max(1, (N + TN_MAX - 1) // TN_MAX)          # number of grid steps
    TN = min(TN_MAX, _round_up((N + g - 1) // g, TN_MIN))
    Np = g * TN                                      # padded row count

    x2 = x.reshape(N, D).astype(jnp.float32)
    if Np != N:
        x2 = jnp.pad(x2, ((0, Np - N), (0, 0)))      # zero rows -> finite exp()

    log_offset = float(0.5 * math.log(n_dims))
    kernel = lambda omg_ref, x_ref, o_ref: _prf_kernel(
        omg_ref, x_ref, o_ref,
        softmax_temp=float(softmax_temp), log_offset=log_offset)

    out_t = pl.pallas_call(
        kernel,
        out_shape=jax.ShapeDtypeStruct((M, Np), jnp.float32),
        grid_spec=pltpu.PrefetchScalarGridSpec(
            num_scalar_prefetch=0,
            grid=(g,),
            in_specs=[
                pl.BlockSpec((M, D), lambda i: (0, 0)),      # omega_gen (scaled)
                pl.BlockSpec((TN, D), lambda i: (i, 0)),     # x rows
            ],
            out_specs=pl.BlockSpec((M, TN), lambda i: (0, i)),
        ),
        compiler_params=pltpu.CompilerParams(
            dimension_semantics=("parallel",)),
    )(omg_scaled, x2)

    out = out_t.T[:N]                                # (N, M)
    return out.reshape(*lead, M)


# ----------------------------------------------------------------------------
# Pure-JAX reference (mirrors the PyTorch forward exactly)
# ----------------------------------------------------------------------------
def _reference(x, omega, w1, b1, w2, b2, *, n_dims, softmax_temp):
    h = omega @ w1 + b1[None, :]
    h = jnp.where(h > 0, h, LEAKY_SLOPE * h)
    omega_gen = jnp.tanh(h @ w2 + b2[None, :])
    xs = x * math.sqrt(softmax_temp)
    norm_sq = jnp.sum(xs * xs, axis=-1, keepdims=True)
    u = jnp.einsum('...d,md->...m', xs, omega_gen)
    return jnp.exp(u - (norm_sq + 0.5 * math.log(n_dims)))


if __name__ == "__main__":
    # Module hyperparameters (defaults: n_dims=None -> n_dims = query_dims - 1)
    query_dims = 32
    noise_dims = (16, 64)          # (noise input dim, generator hidden dim)
    n_dims = query_dims - 1        # = 31
    M = n_dims // 2                # = 15 (omega rows / output feature dim)
    softmax_temp = 1.0 / math.sqrt(query_dims)
    noise_dim, hidden = noise_dims

    key = jax.random.PRNGKey(0)
    k_x, k_om, k_w1, k_b1, k_w2, k_b2 = jax.random.split(key, 6)

    # deterministic synthetic parameters (omega as if drawn by new_feature_map)
    omega = jax.random.normal(k_om, (M, noise_dim), jnp.float32)
    w1 = jax.random.normal(k_w1, (noise_dim, hidden), jnp.float32) * 0.1
    b1 = jax.random.normal(k_b1, (hidden,), jnp.float32) * 0.1
    w2 = jax.random.normal(k_w2, (hidden, query_dims), jnp.float32) * 0.1
    b2 = jax.random.normal(k_b2, (query_dims,), jnp.float32) * 0.1

    # small input: batch=2, seq=64, query_dims=32
    x = jax.random.normal(k_x, (2, 64, query_dims), jnp.float32)

    out = generative_positive_random_features(
        x, omega, w1, b1, w2, b2, n_dims=n_dims, softmax_temp=softmax_temp)
    out = jax.block_until_ready(out)

    ref = _reference(x, omega, w1, b1, w2, b2,
                     n_dims=n_dims, softmax_temp=softmax_temp)

    assert out.shape == (2, 64, M), out.shape
    np.testing.assert_allclose(np.asarray(out), np.asarray(ref),
                               rtol=1e-4, atol=1e-7)
    print("KERNEL_OK")
</pallas_src>

<mosaic_0001>
module attributes {stable_mosaic.version = 11 : i64} {
  func.func @_lambda_(%arg0: i32, %arg1: memref<15x32xf32, #tpu.memory_space<vmem>>, %arg2: memref<256x32xf32, #tpu.memory_space<vmem>>, %arg3: memref<15x256xf32, #tpu.memory_space<vmem>>) attributes {dimension_semantics = [#tpu.dimension_semantics<parallel>], iteration_bounds = array<i64: 1>, scalar_prefetch = 0 : i64, scratch_operands = 0 : i64, tpu.core_type = #tpu.core_type<tc>, window_params = [{pipeline_mode = #tpu.pipeline_mode<synchronous>, transform_indices = @transform_0, window_bounds = array<i64: 15, 32>}, {transform_indices = @transform_1, window_bounds = array<i64: 256, 32>}, {transform_indices = @transform_2, window_bounds = array<i64: 15, 256>}]} {
    %c0 = arith.constant 0 : index
    %c0_0 = arith.constant 0 : index
    %0 = vector.load %arg2[%c0, %c0_0] : memref<256x32xf32, #tpu.memory_space<vmem>>, vector<256x32xf32>
    %c0_1 = arith.constant 0 : index
    %c0_2 = arith.constant 0 : index
    %1 = vector.load %arg1[%c0_1, %c0_2] : memref<15x32xf32, #tpu.memory_space<vmem>>, vector<15x32xf32>
    %cst = arith.constant dense<0.000000e+00> : vector<15x256xf32>
    %2 = tpu.matmul %1, %0, %cst {dimension_numbers = #tpu.dot_dimension_numbers<[1], [1], [0], [0], [0, 0, 1, 0], [], []>} : vector<15x32xf32>, vector<256x32xf32>, vector<15x256xf32> -> vector<15x256xf32>
    %cst_3 = arith.constant 0.176776692 : f32
    %3 = vector.broadcast %cst_3 : f32 to vector<1x32xf32>
    %4 = arith.mulf %0, %0 : vector<256x32xf32>
    %cst_4 = arith.constant dense<0.000000e+00> : vector<1x256xf32>
    %5 = tpu.matmul %3, %4, %cst_4 {dimension_numbers = #tpu.dot_dimension_numbers<[1], [1], [0], [0], [0, 0, 1, 0], [], []>} : vector<1x32xf32>, vector<256x32xf32>, vector<1x256xf32> -> vector<1x256xf32>
    %cst_5 = arith.constant 1.71699357 : f32
    %6 = vector.broadcast %cst_5 : f32 to vector<1x256xf32>
    %7 = arith.addf %5, %6 : vector<1x256xf32>
    %8 = vector.broadcast %7 : vector<1x256xf32> to vector<15x256xf32>
    %9 = arith.subf %2, %8 : vector<15x256xf32>
    %10 = math.exp %9 : vector<15x256xf32>
    %c0_6 = arith.constant 0 : index
    %c0_7 = arith.constant 0 : index
    %11 = vector.load %arg3[%c0_6, %c0_7] : memref<15x256xf32, #tpu.memory_space<vmem>>, vector<15x256xf32>
    tpu.vector_store %arg3[%c0_6, %c0_7], %10 {strides = array<i32>} : memref<15x256xf32, #tpu.memory_space<vmem>>, vector<15x256xf32>,
    return
  }
  func.func @transform_0(%arg0: i32) -> (i32, i32) {
    %c0_i32 = arith.constant 0 : i32
    %c0_i32_0 = arith.constant 0 : i32
    %c0_i32_1 = arith.constant 0 : i32
    return %c0_i32, %c0_i32_0 : i32, i32
  }
  func.func @transform_1(%arg0: i32) -> (i32, i32) {
    %c0_i32 = arith.constant 0 : i32
    %c0_i32_0 = arith.constant 0 : i32
    return %arg0, %c0_i32 : i32, i32
  }
  func.func @transform_2(%arg0: i32) -> (i32, i32) {
    %c0_i32 = arith.constant 0 : i32
    %c0_i32_0 = arith.constant 0 : i32
    return %c0_i32, %arg0 : i32, i32
  }
}

</mosaic_0001>

<bundles_post_ra>
// kernel: tpu_custom_call.1
= control target key start
LH: loop header
LB: loop body
LE: loop exit
PB: predicated region body
PF: predicated region fallthrough
CT: control target
= control target key end

     0   :  { %vm46_vm0 = vcmask 261120   ;;  %v639_v7 = vmov 0.17677669   ;;  %s839_s0 = inlined_call_operand.vmem [shape: f32[15,32], index: 0, kind: input, shape index: {}]   ;;  %s840_s1 = inlined_call_operand.vmem [shape: f32[256,32], index: 1, kind: input, shape index: {}]   ;;  %s841_s2 = inlined_call_operand.hbm [shape: f32[15,256], index: 2, kind: output, shape index: {}]  }
   0x1   :  { %v43_v0 = vld [vmem:[%s840_s1 + $0xf8] sm:$0xff]  ;;  %v42_v2 = vld [vmem:[%s840_s1 + $0xf0] sm:$0xff]  ;;  %603 = vmatprep.mubr.msk.f32.mxu1 %vm46_vm0, %v639_v7  ;;  %v41_v8 = vld [vmem:[%s840_s1 + $0xe8] sm:$0xff] }
   0x2   :  { %v27_v1 = vld [vmem:[%s840_s1 + $0x78] sm:$0xff]  ;;  %535 = vmatprep.subr.msk.mxu0 %vm46_vm0, %v43_v0  ;;  %v257_v4 = vmul.f32 %v43_v0, %v43_v0  ;;  %v256_v5 = vmul.f32 %v42_v2, %v42_v2  ;;  %v26_v6 = vld [vmem:[%s840_s1 + $0x70] sm:$0xff]  ;;  %v255_v10 = vmul.f32 %v41_v8, %v41_v8  ;;  %v25_v11 = vld [vmem:[%s840_s1 + $0x68] sm:$0xff] }
   0x3   :  { %v241_v3 = vmul.f32 %v27_v1, %v27_v1  ;;  %536 = vmatpush3.xpose.msk.msra.mxu0 %vm46_vm0, %v27_v1  ;;  %v240_v9 = vmul.f32 %v26_v6, %v26_v6  ;;  %v40_v12 = vld [vmem:[%s840_s1 + $0xe0] sm:$0xff]  ;;  %v239_v13 = vmul.f32 %v25_v11, %v25_v11  ;;  %v39_v16 = vld [vmem:[%s840_s1 + $0xd8] sm:$0xff] }
   0x4   :  { %571 = vmatprep.subr.msk.mxu1 %vm46_vm0, %v257_v4  ;;  %537 = vmatprep.subr.msk.mxu0 %vm46_vm0, %v42_v2  ;;  %v254_v14 = vmul.f32 %v40_v12, %v40_v12  ;;  %v24_v15 = vld [vmem:[%s840_s1 + $0x60] sm:$0xff] }
   0x5   :  { %572 = vmatpush3.xpose.msk.msra.mxu1 %vm46_vm0, %v241_v3  ;;  %v701_v17 = vld [vmem:[%s839_s0] sm:$0xff] }
   0x6   :  { %573 = vmatprep.subr.msk.mxu1 %vm46_vm0, %v256_v5  ;;  %567 = vmatprep.mubr.msk.f32.mxu0 %vm46_vm0, %v701_v17 }
   0x7   :  { %538 = vmatpush3.xpose.msk.msra.mxu0 %vm46_vm0, %v26_v6 }
   0x8   :  { %539 = vmatprep.subr.msk.mxu0 %vm46_vm0, %v41_v8 }
   0x9   :  { %574 = vmatpush3.xpose.msk.msra.mxu1 %vm46_vm0, %v240_v9 }
   0xa   :  { %575 = vmatprep.subr.msk.mxu1 %vm46_vm0, %v255_v10 }
   0xb   :  { %540 = vmatpush3.xpose.msk.msra.mxu0 %vm46_vm0, %v25_v11 }
   0xc   :  { %541 = vmatprep.subr.msk.mxu0 %vm46_vm0, %v40_v12 }
   0xd   :  { %7 = vsyncpa [#allocation3], 0  ;;  %576 = vmatpush3.xpose.msk.msra.mxu1 %vm46_vm0, %v239_v13  ;;  %v238_v18 = vmul.f32 %v24_v15, %v24_v15  ;;  %v253_v19 = vmul.f32 %v39_v16, %v39_v16  ;;  %v23_v20 = vld [vmem:[%s840_s1 + $0x58] sm:$0xff]  ;;  %v38_v21 = vld [vmem:[%s840_s1 + $0xd0] sm:$0xff]  ;;  %v428_v3 = vlaneseq }
   0xe   :  { %577 = vmatprep.subr.msk.mxu1 %vm46_vm0, %v254_v14  ;;  %v237_v22 = vmul.f32 %v23_v20, %v23_v20  ;;  %v252_v23 = vmul.f32 %v38_v21, %v38_v21  ;;  %v22_v24 = vld [vmem:[%s840_s1 + $0x50] sm:$0xff]  ;;  %v37_v25 = vld [vmem:[%s840_s1 + $0xc8] sm:$0xff]  ;;  %v36_v29 = vld [vmem:[%s840_s1 + $0xc0] sm:$0xff] }
   0xf   :  { %542 = vmatpush3.xpose.msk.msra.mxu0 %vm46_vm0, %v24_v15  ;;  %v236_v26 = vmul.f32 %v22_v24, %v22_v24  ;;  %v251_v27 = vmul.f32 %v37_v25, %v37_v25  ;;  %v21_v28 = vld [vmem:[%s840_s1 + $0x48] sm:$0xff]  ;;  %v250_v31 = vmul.f32 %v36_v29, %v36_v29  ;;  %v20_v32 = vld [vmem:[%s840_s1 + $0x40] sm:$0xff]  ;;  %v35_v33 = vld [vmem:[%s840_s1 + $0xb8] sm:$0xff]  ;;  %v429_v4 = vshrl.u32 %v428_v3, 7 }
  0x10   :  { %543 = vmatprep.subr.msk.mxu0 %vm46_vm0, %v39_v16  ;;  %v235_v30 = vmul.f32 %v21_v28, %v21_v28  ;;  %v234_v34 = vmul.f32 %v20_v32, %v20_v32  ;;  %v249_v35 = vmul.f32 %v35_v33, %v35_v33  ;;  %v19_v36 = vld [vmem:[%s840_s1 + $0x38] sm:$0xff]  ;;  %v34_v37 = vld [vmem:[%s840_s1 + $0xb0] sm:$0xff]  ;;  %v33_v41 = vld [vmem:[%s840_s1 + $0xa8] sm:$0xff] }
  0x11   :  { %578 = vmatpush3.xpose.msk.msra.mxu1 %vm46_vm0, %v238_v18  ;;  %v233_v38 = vmul.f32 %v19_v36, %v19_v36  ;;  %v248_v39 = vmul.f32 %v34_v37, %v34_v37  ;;  %v18_v40 = vld [vmem:[%s840_s1 + $0x30] sm:$0xff]  ;;  %v247_v43 = vmul.f32 %v33_v41, %v33_v41  ;;  %v17_v44 = vld [vmem:[%s840_s1 + $0x28] sm:$0xff]  ;;  %v32_v45 = vld [vmem:[%s840_s1 + $0xa0] sm:$0xff]  ;;  %v430_v6 = vsub.s32 0, %v429_v4 }
  0x12   :  { %579 = vmatprep.subr.msk.mxu1 %vm46_vm0, %v253_v19  ;;  %v232_v42 = vmul.f32 %v18_v40, %v18_v40  ;;  %v231_v46 = vmul.f32 %v17_v44, %v17_v44  ;;  %v246_v47 = vmul.f32 %v32_v45, %v32_v45  ;;  %v16_v48 = vld [vmem:[%s840_s1 + $0x20] sm:$0xff]  ;;  %v31_v49 = vld [vmem:[%s840_s1 + $0x98] sm:$0xff]  ;;  %v30_v53 = vld [vmem:[%s840_s1 + $0x90] sm:$0xff] }
  0x13   :  { %544 = vmatpush3.xpose.msk.msra.mxu0 %vm46_vm0, %v23_v20  ;;  %v230_v50 = vmul.f32 %v16_v48, %v16_v48  ;;  %v245_v51 = vmul.f32 %v31_v49, %v31_v49  ;;  %v15_v52 = vld [vmem:[%s840_s1 + $0x18] sm:$0xff]  ;;  %v244_v55 = vmul.f32 %v30_v53, %v30_v53  ;;  %v14_v56 = vld [vmem:[%s840_s1 + $0x10] sm:$0xff]  ;;  %v29_v57 = vld [vmem:[%s840_s1 + $0x88] sm:$0xff] }
  0x14   :  { %545 = vmatprep.subr.msk.mxu0 %vm46_vm0, %v38_v21  ;;  %v229_v54 = vmul.f32 %v15_v52, %v15_v52  ;;  %v228_v58 = vmul.f32 %v14_v56, %v14_v56  ;;  %v243_v59 = vmul.f32 %v29_v57, %v29_v57  ;;  %v13_v60 = vld [vmem:[%s840_s1 + $0x8] sm:$0xff]  ;;  %v28_v61 = vld [vmem:[%s840_s1 + $0x80] sm:$0xff] }
  0x15   :  { %580 = vmatpush3.xpose.msk.msra.mxu1 %vm46_vm0, %v237_v22  ;;  %v227_v62 = vmul.f32 %v13_v60, %v13_v60  ;;  %v242_v63 = vmul.f32 %v28_v61, %v28_v61  ;;  %v12_v0 = vld [vmem:[%s840_s1] sm:$0xff]  ;;  %v45_v2 = vld [vmem:[%s839_s0 + $0x8] sm:$0x7f]  ;;  %s640_s0 = smov [#allocation2]  }
  0x16   :  { %581 = vmatprep.subr.msk.mxu1 %vm46_vm0, %v252_v23  ;;  %v226_v1 = vmul.f32 %v12_v0, %v12_v0  ;;  %s457_s1 = sshll.u32 %s640_s0, 4  ;;  %s458_s1 = int_to_ptr.vmem [resolvable:$true] %s457_s1 }
  0x17   :  { %546 = vmatpush3.xpose.msk.msra.mxu0 %vm46_vm0, %v22_v24  ;;  %s617_s21 = scalar_lea.vmem %s458_s1, 512  ;;  %p622_p1 = scmp.lt.s32.totalorder %s458_s1, %s458_s1 }
  0x18   :  { %547 = vmatprep.subr.msk.mxu0 %vm46_vm0, %v37_v25  ;;  %p618_p0 = scmp.ne.s32.totalorder %s458_s1, %s617_s21  ;;  %p623_p2 = scmp.lt.s32.totalorder %s617_s21, %s617_s21 }
  0x19   :  { %582 = vmatpush3.xpose.msk.msra.mxu1 %vm46_vm0, %v236_v26 }
  0x1a   :  { %583 = vmatprep.subr.msk.mxu1 %vm46_vm0, %v251_v27  ;;  %p624_p3 = por %p623_p2, %p622_p1 }
  0x1b   :  { %548 = vmatpush3.xpose.msk.msra.mxu0 %vm46_vm0, %v21_v28 }
  0x1c   :  { %549 = vmatprep.subr.msk.mxu0 %vm46_vm0, %v36_v29  ;;  %p625_p4 = pnand %p624_p3, %p618_p0 }
  0x1d   :  { %584 = vmatpush3.xpose.msk.msra.mxu1 %vm46_vm0, %v235_v30 }
  0x1e   :  { %585 = vmatprep.subr.msk.mxu1 %vm46_vm0, %v250_v31 }
  0x1f   :  { %550 = vmatpush3.xpose.msk.msra.mxu0 %vm46_vm0, %v20_v32 }
  0x20   :  { %551 = vmatprep.subr.msk.mxu0 %vm46_vm0, %v35_v33 }
  0x21   :  { %586 = vmatpush3.xpose.msk.msra.mxu1 %vm46_vm0, %v234_v34 }
  0x22   :  { %587 = vmatprep.subr.msk.mxu1 %vm46_vm0, %v249_v35 }
  0x23   :  { %552 = vmatpush3.xpose.msk.msra.mxu0 %vm46_vm0, %v19_v36 }
  0x24   :  { %553 = vmatprep.subr.msk.mxu0 %vm46_vm0, %v34_v37 }
  0x25   :  { %588 = vmatpush3.xpose.msk.msra.mxu1 %vm46_vm0, %v233_v38 }
  0x26   :  { %589 = vmatprep.subr.msk.mxu1 %vm46_vm0, %v248_v39 }
  0x27   :  { %554 = vmatpush3.xpose.msk.msra.mxu0 %vm46_vm0, %v18_v40 }
  0x28   :  { %555 = vmatprep.subr.msk.mxu0 %vm46_vm0, %v33_v41 }
  0x29   :  { %590 = vmatpush3.xpose.msk.msra.mxu1 %vm46_vm0, %v232_v42 }
  0x2a   :  { %591 = vmatprep.subr.msk.mxu1 %vm46_vm0, %v247_v43 }
  0x2b   :  { %556 = vmatpush3.xpose.msk.msra.mxu0 %vm46_vm0, %v17_v44 }
  0x2c   :  { %557 = vmatprep.subr.msk.mxu0 %vm46_vm0, %v32_v45 }
  0x2d   :  { %592 = vmatpush3.xpose.msk.msra.mxu1 %vm46_vm0, %v231_v46 }
  0x2e   :  { %593 = vmatprep.subr.msk.mxu1 %vm46_vm0, %v246_v47 }
  0x2f   :  { %558 = vmatpush3.xpose.msk.msra.mxu0 %vm46_vm0, %v16_v48 }
  0x30   :  { %559 = vmatprep.subr.msk.mxu0 %vm46_vm0, %v31_v49 }
  0x31   :  { %594 = vmatpush3.xpose.msk.msra.mxu1 %vm46_vm0, %v230_v50 }
  0x32   :  { %595 = vmatprep.subr.msk.mxu1 %vm46_vm0, %v245_v51 }
  0x33   :  { %560 = vmatpush3.xpose.msk.msra.mxu0 %vm46_vm0, %v15_v52 }
  0x34   :  { %561 = vmatprep.subr.msk.mxu0 %vm46_vm0, %v30_v53 }
  0x35   :  { %596 = vmatpush3.xpose.msk.msra.mxu1 %vm46_vm0, %v229_v54 }
  0x36   :  { %597 = vmatprep.subr.msk.mxu1 %vm46_vm0, %v244_v55 }
  0x37   :  { %562 = vmatpush3.xpose.msk.msra.mxu0 %vm46_vm0, %v14_v56 }
  0x38   :  { %563 = vmatprep.subr.msk.mxu0 %vm46_vm0, %v29_v57 }
  0x39   :  { %598 = vmatpush3.xpose.msk.msra.mxu1 %vm46_vm0, %v228_v58 }
  0x3a   :  { %599 = vmatprep.subr.msk.mxu1 %vm46_vm0, %v243_v59 }
  0x3b   :  { %564 = vmatpush3.xpose.msk.msra.mxu0 %vm46_vm0, %v13_v60 }
  0x3c   :  { %565 = vmatprep.subr.msk.mxu0 %vm46_vm0, %v28_v61 }
  0x3d   :  { %600 = vmatpush3.xpose.msk.msra.mxu1 %vm46_vm0, %v227_v62 }
  0x3e   :  { %601 = vmatprep.subr.msk.mxu1 %vm46_vm0, %v242_v63 }
  0x3f   :  { %566 = vmatpush3.xpose.msk.msra.mxu0 %vm46_vm0, %v12_v0 }
  0x41   :  { %602 = vmatpush3.xpose.msk.msra.mxu1 %vm46_vm0, %v226_v1 }
  0x42   :  { %568 = vmatmul.mubr.msk.f32.vlgmr.msra.gmra.mxu0 %vm46_vm0, %v701_v17 }
  0x43   :  { %569 = vmatprep.mubr.msk.f32.mxu0 %vm46_vm0, %v45_v2 }
  0x44   :  { %604 = vmatmul.mubr.msk.f32.vlgmr.msra.gmra.mxu1 %vm46_vm0, %v639_v7 }
  0x46   :  { %570 = vmatmul.mubr.msk.f32.gmra.mxu0 %vm46_vm0, %v45_v2 }
 0x102   :  { %v215_v5 = vpop.f32.mrf.mxu0 }
 0x104   :  { %v217_v8 = vpop.f32.mrf.mxu0  ;;  %v423_v9 = vpop.f32.mrf.mxu1 }
 0x105   :  { %v424_v10 = vadd.f32 1.7169936, %v423_v9 }
 0x106   :  { %v221_v11 = vpop.f32.mrf.mxu0  ;;  %v425_v12 = vpop.f32.mrf.mxu1 }
 0x107   :  { %v431_v13 = vrot.slane %v424_v10, %v430_v6  ;;  %v426_v14 = vadd.f32 1.7169936, %v425_v12 }
 0x108   :  { %v223_v18 = vpop.f32.mrf.mxu0 }
 0x109   :  { %v436_v15 = vsub.f32 %v215_v5, %v431_v13  ;;  %v438_v16 = vsub.f32 %v221_v11, %v431_v13  ;;  %v435_v17 = vrot.slane %v426_v14, %v430_v6 }
 0x10b   :  { %v440_v19 = vmul.f32 1.442695, %v436_v15  ;;  %v444_v20 = vmul.f32 1.442695, %v438_v16  ;;  %v437_v7 = vsub.f32 %v217_v8, %v435_v17  ;;  %v439_v21 = vsub.f32 %v223_v18, %v435_v17 }
 0x10d   :  { %609 = vpow2.f32 %v440_v19  ;;  %v442_v22 = vmul.f32 1.442695, %v437_v7  ;;  %v446_v23 = vmul.f32 1.442695, %v439_v21 }
 0x10e   :  { %611 = vpow2.f32 %v444_v20 }
 0x10f   :  { %613 = vpow2.f32 %v442_v22 }
 0x110   :  { %615 = vpow2.f32 %v446_v23 }
 0x11a   :  { %v610_v24 = vpop.eup %609 }
 0x11b   :  { %v612_v25 = vpop.eup %611  ;;  %448 = vst [vmem:[#allocation2] sm:$0xff] %v610_v24 }
 0x11c   :  { %v614_v26 = vpop.eup %613  ;;  %450 = vst [vmem:[#allocation2 + $0x10] sm:$0x7f] %v612_v25 }
 0x11d   :  { %v616_v27 = vpop.eup %615  ;;  %449 = vst [vmem:[#allocation2 + $0x8] sm:$0xff] %v614_v26 }
 0x11e   :  { %451 = vst [vmem:[#allocation2 + $0x18] sm:$0x7f] %v616_v27 }
 0x11f   :  { %628 = shalt.err (!%p625_p4)
}
 0x120   :  { %s641_s22 = smov 256   ;;  %s642_s23 = smov 16  }
 0x121   :  { %463 = dma.vmem_to_hbm [thread:$0]  %s458_s1, 512, %s841_s2, [#allocation3], %s641_s22, %s641_s22, %s642_s23  }
 0x122   :  { %637 = dma.done.wait [#allocation3], 512  }
 0x123   :  { %638 = vsyncadd [#allocation3], 4294966784 }
 0x124   :  { %467 = vsyncpa [#allocation3], 1 }

</bundles_post_ra>
